<compile_context>
chip_gen: v6e
topology: v6e:2x2x1
jax: 0.10.0
libtpu: 0.0.40
codegen_flags: <defaults>
</compile_context>

<pallas_src>
import functools

import numpy as np

import jax
import jax.numpy as jnp
from jax import lax
from jax.experimental import pallas as pl
from jax.experimental.pallas import tpu as pltpu


_INV_SQRT2 = 0.7071067811865476
_SQRT_2_OVER_PI = 0.7978845608028654


def _gelu_exact(x):
    # Matches torch.nn.GELU() default (erf-based).
    return 0.5 * x * (1.0 + lax.erf(x * _INV_SQRT2))


def _gelu_tanh(x):
    # Cheaper tanh approximation (EUP slot); opt-in only, not PyTorch default.
    return 0.5 * x * (1.0 + jnp.tanh(_SQRT_2_OVER_PI * (x + 0.044715 * x * x * x)))


# --------------------------------------------------------------------------- #
# Kernels
# --------------------------------------------------------------------------- #
def _rugby_mlp_fused_kernel(gelu_fn, x_ref, w1_ref, b1_ref, w2_ref, b2_ref, o_ref):
    """Column grid == 1: both linears + GELUs fused, no scratch, no pl.when."""
    x = x_ref[...].astype(jnp.bfloat16)
    w1 = w1_ref[...].astype(jnp.bfloat16)
    h = jnp.dot(x, w1, preferred_element_type=jnp.float32)
    h = gelu_fn(h + b1_ref[...])
    # Dropout(p=0.0) is the identity -> nothing to do.
    w2 = w2_ref[...].astype(jnp.bfloat16)
    y = jnp.dot(h.astype(jnp.bfloat16), w2, preferred_element_type=jnp.float32)
    y = gelu_fn(y + b2_ref[...])
    o_ref[...] = y.astype(o_ref.dtype)


def _rugby_mlp_coltiled_kernel(gelu_fn, x_ref, w1_ref, b1_ref, w2_ref, b2_ref,
                               o_ref, h_ref):
    """Large-H path: W2 column-tiled; GELU(x@W1+b1) cached in VMEM per batch tile."""
    @pl.when(pl.program_id(1) == 0)
    def _():
        x = x_ref[...].astype(jnp.bfloat16)
        w1 = w1_ref[...].astype(jnp.bfloat16)
        h = jnp.dot(x, w1, preferred_element_type=jnp.float32)
        h_ref[...] = gelu_fn(h + b1_ref[...]).astype(h_ref.dtype)

    w2 = w2_ref[...].astype(jnp.bfloat16)
    y = jnp.dot(h_ref[...], w2, preferred_element_type=jnp.float32)
    y = gelu_fn(y + b2_ref[...])
    o_ref[...] = y.astype(o_ref.dtype)


# --------------------------------------------------------------------------- #
# Wrapper helpers
# --------------------------------------------------------------------------- #
def _round_up(a, m):
    return (a + m - 1) // m * m


def _vmem_capacity_bytes():
    try:
        info = pltpu.get_tpu_info()
        cap = getattr(info, "vmem_capacity_bytes", None)
        if cap:
            return int(cap)
    except Exception:
        pass
    return 64 * 1024 * 1024  # conservative (v7x per-TC)


def _is_multi_tensorcore():
    # Only split small batches across TCs on parts with >1 TC per chip.
    try:
        kind = jax.devices()[0].device_kind.lower()
        return ("v7" in kind) or ("v4" in kind) or ("v5p" in kind) or ("v5 p" in kind)
    except Exception:
        return False


def _invariant_spec(block_shape, index_map):
    # Grid-invariant operand: single-buffer it (no pipelining benefit from 2).
    if hasattr(pl, "Buffered"):
        try:
            return pl.BlockSpec(block_shape, index_map, pipeline_mode=pl.Buffered(1))
        except TypeError:
            pass
    return pl.BlockSpec(block_shape, index_map)


def _pick_tb(B, tb_target):
    """Batch tile: <= target, multiple of 8, balanced across steps (min waste)."""
    if B <= tb_target:
        return _round_up(B, 8)
    steps = pl.cdiv(B, tb_target)
    return _round_up(pl.cdiv(B, steps), 8)


def _pick_tn(H, tn_target):
    """Largest 128-multiple divisor of H that is <= tn_target (lane-dense slab)."""
    t = (tn_target // 128) * 128
    while t >= 128:
        if H % t == 0:
            return t
        t -= 128
    return H  # H not a multiple of 128: keep the full (masked) slab


def _vmem_need_bytes(tb, F, H, tn, nj, x_item, w_item, out_item):
    x_b = 2 * tb * F * x_item                      # double-buffered x tile
    w1_b = F * H * w_item                          # single-buffered (invariant)
    b1_b = H * 4
    if nj == 1:
        w2_b = H * tn * w_item                     # single-buffered (invariant)
        b2_b = tn * 4
        h_b = 0
    else:
        w2_b = 2 * H * tn * w_item                 # double-buffered column slab
        b2_b = 2 * tn * 4
        h_b = tb * H * 2                           # bf16 hidden scratch
    o_b = 2 * tb * tn * out_item                   # double-buffered output tile
    return x_b + w1_b + b1_b + w2_b + b2_b + o_b + h_b


# --------------------------------------------------------------------------- #
# Public entry point
# --------------------------------------------------------------------------- #
def rugby_mlp(x, w1, b1, w2, b2, *, tb=None, tn=512, out_dtype=None,
              approximate_gelu=False):
    """RugbyMLP forward (norm=None, dropout=0): GELU(GELU(x@W1+b1)@W2+b2).

    x: [B, F]; w1: [F, H]; b1: [H]; w2: [H, H]; b2: [H]  (H = F * layers).
    Pass weights already in bf16 to avoid any per-call cast traffic (the kernel
    casts matmul operands to bf16 in-register; it is a no-op for bf16 inputs).
    """
    B, F = x.shape
    Fw, H = w1.shape
    assert Fw == F and w2.shape == (H, H)
    out_dtype = x.dtype if out_dtype is None else np.dtype(out_dtype)
    gelu_fn = _gelu_tanh if approximate_gelu else _gelu_exact

    phys_vmem = _vmem_capacity_bytes()
    multi_tc = _is_multi_tensorcore()

    # --- batch tile: fill the MXU M dim; bigger tiles on 128 MiB VMEM parts ---
    if tb is None:
        tb = 512 if phys_vmem >= (100 << 20) else 256
    tb_eff = _pick_tb(B, tb)
    if multi_tc and B >= 256 and pl.cdiv(B, tb_eff) < 2:
        tb_eff = _round_up(pl.cdiv(B, 2), 8)       # >=2 steps only helps multi-TC
    ni = pl.cdiv(B, tb_eff)

    # --- W2 tiling: keep fully resident when it fits comfortably in VMEM ------
    w2_resident_budget = (16 << 20) if phys_vmem <= (64 << 20) else (32 << 20)
    if H * H * w2.dtype.itemsize <= w2_resident_budget:
        tn_eff = H                                  # resident: no per-batch re-stream
    else:
        tn_eff = _pick_tn(H, tn)
    nj = H // tn_eff

    b1_2d = jnp.asarray(b1, jnp.float32).reshape(1, H)
    b2_2d = jnp.asarray(b2, jnp.float32).reshape(1, H)

    if nj == 1:
        kernel = functools.partial(_rugby_mlp_fused_kernel, gelu_fn)
        grid = (ni,)
        in_specs = [
            pl.BlockSpec((tb_eff, F), lambda i: (i, 0)),      # x tile (varies)
            _invariant_spec((F, H), lambda i: (0, 0)),        # W1 (resident)
            _invariant_spec((1, H), lambda i: (0, 0)),        # b1
            _invariant_spec((H, H), lambda i: (0, 0)),        # W2 (resident)
            _invariant_spec((1, H), lambda i: (0, 0)),        # b2
        ]
        out_specs = pl.BlockSpec((tb_eff, H), lambda i: (i, 0))
        scratch_shapes = []
        dim_sem = ("parallel",)
    else:
        kernel = functools.partial(_rugby_mlp_coltiled_kernel, gelu_fn)
        grid = (ni, nj)
        in_specs = [
            pl.BlockSpec((tb_eff, F), lambda i, j: (i, 0)),   # x tile
            _invariant_spec((F, H), lambda i, j: (0, 0)),     # W1 (resident)
            _invariant_spec((1, H), lambda i, j: (0, 0)),     # b1
            pl.BlockSpec((H, tn_eff), lambda i, j: (0, j)),   # W2 column slab
            pl.BlockSpec((1, tn_eff), lambda i, j: (0, j)),   # b2 slab
        ]
        out_specs = pl.BlockSpec((tb_eff, tn_eff), lambda i, j: (i, j))
        scratch_shapes = [pltpu.VMEM((tb_eff, H), jnp.bfloat16)]
        dim_sem = ("parallel", "arbitrary")

    need = _vmem_need_bytes(tb_eff, F, H, tn_eff, nj,
                            x.dtype.itemsize, w1.dtype.itemsize,
                            out_dtype.itemsize if hasattr(out_dtype, "itemsize")
                            else np.dtype(out_dtype).itemsize)
    cap = min(phys_vmem - (8 << 20), 100 << 20)     # headroom on v7x; ~100 MiB elsewhere
    vmem_limit = int(min(cap, max(2 * need, 32 << 20)))

    return pl.pallas_call(
        kernel,
        out_shape=jax.ShapeDtypeStruct((B, H), out_dtype),
        grid_spec=pltpu.PrefetchScalarGridSpec(
            num_scalar_prefetch=0,
            grid=grid,
            in_specs=in_specs,
            out_specs=out_specs,
            scratch_shapes=scratch_shapes,
        ),
        compiler_params=pltpu.CompilerParams(
            dimension_semantics=dim_sem,
            vmem_limit_bytes=vmem_limit,
        ),
    )(x, w1, b1_2d, w2, b2_2d)


# --------------------------------------------------------------------------- #
# References
# --------------------------------------------------------------------------- #
def rugby_mlp_ref_bf16(x, w1, b1, w2, b2):
    # Mirrors the kernel math: bf16 matmul inputs, f32 accumulation + GELU.
    h = jnp.dot(x.astype(jnp.bfloat16), w1.astype(jnp.bfloat16),
                preferred_element_type=jnp.float32) + b1
    h = jax.nn.gelu(h, approximate=False).astype(jnp.bfloat16)
    y = jnp.dot(h, w2.astype(jnp.bfloat16),
                preferred_element_type=jnp.float32) + b2
    return jax.nn.gelu(y, approximate=False)


def rugby_mlp_ref_f32(x, w1, b1, w2, b2):
    # Exact-f32 PyTorch-semantics reference (looser tolerance vs bf16 kernel).
    h = jax.nn.gelu(x @ w1 + b1, approximate=False)
    return jax.nn.gelu(h @ w2 + b2, approximate=False)


if __name__ == "__main__":
    # Small shapes consistent with RugbyMLP(feature_size=128, layers=2):
    #   F = 128, H = F * 2 = 256.
    F, LAYERS = 128, 2
    H = F * LAYERS

    key = jax.random.PRNGKey(0)
    kx, k1, k2, k3, k4, kx2 = jax.random.split(key, 6)

    # Deterministic synthetic parameter init (nn.Linear-like scale).
    w1 = jax.random.uniform(k1, (F, H), jnp.float32, -1.0, 1.0) / jnp.sqrt(F)
    b1 = jax.random.uniform(k2, (H,), jnp.float32, -1.0, 1.0) / jnp.sqrt(F)
    w2 = jax.random.uniform(k3, (H, H), jnp.float32, -1.0, 1.0) / jnp.sqrt(H)
    b2 = jax.random.uniform(k4, (H,), jnp.float32, -1.0, 1.0) / jnp.sqrt(H)

    # Pre-cast weights to bf16 ONCE (avoids per-call cast HBM traffic).
    w1_bf = w1.astype(jnp.bfloat16)
    w2_bf = w2.astype(jnp.bfloat16)

    # Case 1: aligned small batch.
    B = 8
    x = jax.random.normal(kx, (B, F), dtype=jnp.float32)
    out = jax.block_until_ready(rugby_mlp(x, w1_bf, b1, w2_bf, b2))
    assert out.shape == (B, H)
    ref_bf = rugby_mlp_ref_bf16(x, w1, b1, w2, b2)
    ref_f32 = rugby_mlp_ref_f32(x, w1, b1, w2, b2)
    assert jnp.allclose(out, ref_bf, atol=3e-3, rtol=3e-3), "mismatch vs bf16 reference"
    assert jnp.allclose(out, ref_f32, atol=5e-2, rtol=5e-2), "mismatch vs f32 reference"

    # Case 2: ragged batch (exercises the masked partial last tile, no padding).
    B2 = 20
    x2 = jax.random.normal(kx2, (B2, F), dtype=jnp.float32)
    out2 = jax.block_until_ready(rugby_mlp(x2, w1_bf, b1, w2_bf, b2))
    assert out2.shape == (B2, H)
    ref2 = rugby_mlp_ref_bf16(x2, w1, b1, w2, b2)
    assert jnp.allclose(out2, ref2, atol=3e-3, rtol=3e-3), "mismatch vs bf16 reference (ragged)"

    print("KERNEL_OK")
</pallas_src>

<mosaic_0001>
module attributes {stable_mosaic.version = 11 : i64} {
  func.func @_rugby_mlp_fused_kernel(%arg0: i32, %arg1: memref<8x128xf32, #tpu.memory_space<vmem>>, %arg2: memref<128x256xbf16, #tpu.memory_space<vmem>>, %arg3: memref<1x256xf32, #tpu.memory_space<vmem>>, %arg4: memref<256x256xbf16, #tpu.memory_space<vmem>>, %arg5: memref<1x256xf32, #tpu.memory_space<vmem>>, %arg6: memref<8x256xf32, #tpu.memory_space<vmem>>) attributes {dimension_semantics = [#tpu.dimension_semantics<parallel>], iteration_bounds = array<i64: 1>, scalar_prefetch = 0 : i64, scratch_operands = 0 : i64, tpu.core_type = #tpu.core_type<tc>, window_params = [{transform_indices = @transform_0, window_bounds = array<i64: 8, 128>}, {pipeline_mode = #tpu.pipeline_mode<synchronous>, transform_indices = @transform_1, window_bounds = array<i64: 128, 256>}, {pipeline_mode = #tpu.pipeline_mode<synchronous>, transform_indices = @transform_2, window_bounds = array<i64: 1, 256>}, {pipeline_mode = #tpu.pipeline_mode<synchronous>, transform_indices = @transform_3, window_bounds = array<i64: 256, 256>}, {pipeline_mode = #tpu.pipeline_mode<synchronous>, transform_indices = @transform_4, window_bounds = array<i64: 1, 256>}, {transform_indices = @transform_5, window_bounds = array<i64: 8, 256>}]} {
    %c0 = arith.constant 0 : index
    %c0_0 = arith.constant 0 : index
    %0 = vector.load %arg1[%c0, %c0_0] : memref<8x128xf32, #tpu.memory_space<vmem>>, vector<8x128xf32>
    %1 = arith.truncf %0 : vector<8x128xf32> to vector<8x128xbf16>
    %c0_1 = arith.constant 0 : index
    %c0_2 = arith.constant 0 : index
    %2 = vector.load %arg2[%c0_1, %c0_2] : memref<128x256xbf16, #tpu.memory_space<vmem>>, vector<128x256xbf16>
    %cst = arith.constant dense<0.000000e+00> : vector<8x256xf32>
    %3 = tpu.matmul %1, %2, %cst {dimension_numbers = #tpu.dot_dimension_numbers<[1], [0], [0], [1], [0, 0, 1, 1], [], []>} : vector<8x128xbf16>, vector<128x256xbf16>, vector<8x256xf32> -> vector<8x256xf32>
    %c0_3 = arith.constant 0 : index
    %c0_4 = arith.constant 0 : index
    %4 = vector.load %arg3[%c0_3, %c0_4] : memref<1x256xf32, #tpu.memory_space<vmem>>, vector<1x256xf32>
    %5 = vector.broadcast %4 : vector<1x256xf32> to vector<8x256xf32>
    %6 = arith.addf %3, %5 : vector<8x256xf32>
    %cst_5 = arith.constant 5.000000e-01 : f32
    %7 = vector.broadcast %cst_5 : f32 to vector<8x256xf32>
    %8 = arith.mulf %7, %6 : vector<8x256xf32>
    %cst_6 = arith.constant 0.707106769 : f32
    %9 = vector.broadcast %cst_6 : f32 to vector<8x256xf32>
    %10 = arith.mulf %6, %9 : vector<8x256xf32>
    %11 = math.erf %10 : vector<8x256xf32>
    %cst_7 = arith.constant 1.000000e+00 : f32
    %12 = vector.broadcast %cst_7 : f32 to vector<8x256xf32>
    %13 = arith.addf %12, %11 : vector<8x256xf32>
    %14 = arith.mulf %8, %13 : vector<8x256xf32>
    %c0_8 = arith.constant 0 : index
    %c0_9 = arith.constant 0 : index
    %15 = vector.load %arg4[%c0_8, %c0_9] : memref<256x256xbf16, #tpu.memory_space<vmem>>, vector<256x256xbf16>
    %16 = arith.truncf %14 : vector<8x256xf32> to vector<8x256xbf16>
    %cst_10 = arith.constant dense<0.000000e+00> : vector<8x256xf32>
    %17 = tpu.matmul %16, %15, %cst_10 {dimension_numbers = #tpu.dot_dimension_numbers<[1], [0], [0], [1], [0, 0, 1, 1], [], []>} : vector<8x256xbf16>, vector<256x256xbf16>, vector<8x256xf32> -> vector<8x256xf32>
    %c0_11 = arith.constant 0 : index
    %c0_12 = arith.constant 0 : index
    %18 = vector.load %arg5[%c0_11, %c0_12] : memref<1x256xf32, #tpu.memory_space<vmem>>, vector<1x256xf32>
    %19 = vector.broadcast %18 : vector<1x256xf32> to vector<8x256xf32>
    %20 = arith.addf %17, %19 : vector<8x256xf32>
    %cst_13 = arith.constant 5.000000e-01 : f32
    %21 = vector.broadcast %cst_13 : f32 to vector<8x256xf32>
    %22 = arith.mulf %21, %20 : vector<8x256xf32>
    %cst_14 = arith.constant 0.707106769 : f32
    %23 = vector.broadcast %cst_14 : f32 to vector<8x256xf32>
    %24 = arith.mulf %20, %23 : vector<8x256xf32>
    %25 = math.erf %24 : vector<8x256xf32>
    %cst_15 = arith.constant 1.000000e+00 : f32
    %26 = vector.broadcast %cst_15 : f32 to vector<8x256xf32>
    %27 = arith.addf %26, %25 : vector<8x256xf32>
    %28 = arith.mulf %22, %27 : vector<8x256xf32>
    %c0_16 = arith.constant 0 : index
    %c0_17 = arith.constant 0 : index
    %29 = vector.load %arg6[%c0_16, %c0_17] : memref<8x256xf32, #tpu.memory_space<vmem>>, vector<8x256xf32>
    tpu.vector_store %arg6[%c0_16, %c0_17], %28 {strides = array<i32>} : memref<8x256xf32, #tpu.memory_space<vmem>>, vector<8x256xf32>,
    return
  }
  func.func @transform_0(%arg0: i32) -> (i32, i32) {
    %c0_i32 = arith.constant 0 : i32
    %c0_i32_0 = arith.constant 0 : i32
    return %arg0, %c0_i32 : i32, i32
  }
  func.func @transform_1(%arg0: i32) -> (i32, i32) {
    %c0_i32 = arith.constant 0 : i32
    %c0_i32_0 = arith.constant 0 : i32
    %c0_i32_1 = arith.constant 0 : i32
    return %c0_i32, %c0_i32_0 : i32, i32
  }
  func.func @transform_2(%arg0: i32) -> (i32, i32) {
    %c0_i32 = arith.constant 0 : i32
    %c0_i32_0 = arith.constant 0 : i32
    %c0_i32_1 = arith.constant 0 : i32
    return %c0_i32, %c0_i32_0 : i32, i32
  }
  func.func @transform_3(%arg0: i32) -> (i32, i32) {
    %c0_i32 = arith.constant 0 : i32
    %c0_i32_0 = arith.constant 0 : i32
    %c0_i32_1 = arith.constant 0 : i32
    return %c0_i32, %c0_i32_0 : i32, i32
  }
  func.func @transform_4(%arg0: i32) -> (i32, i32) {
    %c0_i32 = arith.constant 0 : i32
    %c0_i32_0 = arith.constant 0 : i32
    %c0_i32_1 = arith.constant 0 : i32
    return %c0_i32, %c0_i32_0 : i32, i32
  }
  func.func @transform_5(%arg0: i32) -> (i32, i32) {
    %c0_i32 = arith.constant 0 : i32
    %c0_i32_0 = arith.constant 0 : i32
    return %arg0, %c0_i32 : i32, i32
  }
}

</mosaic_0001>

<bundles_post_ra>
// kernel: tpu_custom_call.1
= control target key start
LH: loop header
LB: loop body
LE: loop exit
PB: predicated region body
PF: predicated region fallthrough
CT: control target
= control target key end

     0   :  { %10 = vsyncpa [#allocation3], 0  ;;  %s773_s0 = inlined_call_operand.hbm [shape: f32[8,128], index: 0, kind: input, shape index: {}]   ;;  %s774_s1 = inlined_call_operand.hbm [shape: bf16[128,256], index: 1, kind: input, shape index: {}]   ;;  %s775_s2 = inlined_call_operand.vmem [shape: f32[1,256], index: 2, kind: input, shape index: {}]   ;;  %s776_s3 = inlined_call_operand.hbm [shape: bf16[256,256], index: 3, kind: input, shape index: {}]   ;;  %s777_s4 = inlined_call_operand.vmem [shape: f32[1,256], index: 4, kind: input, shape index: {}]   ;;  %s778_s5 = inlined_call_operand.hbm [shape: f32[8,256], index: 5, kind: output, shape index: {}]  }
   0x1   :  { %11 = vsyncpa [#allocation6], 0 }
   0x2   :  { %12 = vsyncpa [#allocation4], 0  ;;  %s718_s18 = smov [#allocation5]  }
   0x3   :  { %s28_s19 = sshll.u32 %s718_s18, 4  ;;  %s29_s19 = int_to_ptr.vmem [resolvable:$true] %s28_s19 }
   0x4   :  { %s640_s20 = scalar_lea.vmem %s29_s19, 2048  ;;  %p645_p1 = scmp.lt.s32.totalorder %s29_s19, %s29_s19 }
   0x5   :  { %p641_p0 = scmp.ne.s32.totalorder %s29_s19, %s640_s20  ;;  %p646_p2 = scmp.lt.s32.totalorder %s640_s20, %s640_s20 }
   0x7   :  { %p647_p3 = por %p646_p2, %p645_p1 }
   0x9   :  { %p648_p4 = pnand %p647_p3, %p641_p0 }
   0xb   :  { %651 = shalt.err (!%p648_p4)
}
   0xc   :  { %s719_s21 = smov 128   ;;  %s720_s22 = smov 8  }
   0xd   :  { %34 = dma.hbm_to_vmem [thread:$0]  %s774_s1, 2048, %s29_s19, [#allocation6], %s719_s21, %s719_s21, %s720_s22  }
   0xe   :  { %s721_s25 = smov [#allocation2]   ;;  %s722_s27 = smov [#allocation7]  }
   0xf   :  { %s19_s26 = sshll.u32 %s721_s25, 4  ;;  %s42_s28 = sshll.u32 %s722_s27, 4  ;;  %s20_s26 = int_to_ptr.vmem [resolvable:$true] %s19_s26  ;;  %s43_s28 = int_to_ptr.vmem [resolvable:$true] %s42_s28 }
  0x10   :  { %s660_s29 = scalar_lea.vmem %s20_s26, 128  ;;  %p665_p6 = scmp.lt.s32.totalorder %s20_s26, %s20_s26 }
  0x11   :  { %p661_p5 = scmp.ne.s32.totalorder %s20_s26, %s660_s29  ;;  %p666_p7 = scmp.lt.s32.totalorder %s660_s29, %s660_s29 }
  0x13   :  { %p667_p8 = por %p666_p7, %p665_p6 }
  0x15   :  { %p668_p9 = pnand %p667_p8, %p661_p5 }
  0x17   :  { %671 = shalt.err (!%p668_p9)
}
  0x18   :  { %22 = dma.hbm_to_vmem [thread:$0]  %s773_s0, 128, %s20_s26, [#allocation3]  }
  0x19   :  { %s680_s7 = scalar_lea.vmem %s43_s28, 4096  ;;  %p685_p11 = scmp.lt.s32.totalorder %s43_s28, %s43_s28 }
  0x1a   :  { %p681_p10 = scmp.ne.s32.totalorder %s43_s28, %s680_s7  ;;  %p686_p12 = scmp.lt.s32.totalorder %s680_s7, %s680_s7 }
  0x1c   :  { %p687_p13 = por %p686_p12, %p685_p11 }
  0x1e   :  { %p688_p0 = pnand %p687_p13, %p681_p10 }
  0x20   :  { %691 = shalt.err (!%p688_p0)
}
  0x21   :  { %48 = dma.hbm_to_vmem [thread:$0]  %s776_s3, 4096, %s43_s28, [#allocation6], %s719_s21, %s719_s21, %s720_s22  }
  0x22   :  { %712 = dma.done.wait [#allocation3], 128  }
  0x23   :  { %713 = vsyncadd [#allocation3], 4294967168 }
  0x24   :  { %714 = dma.done.wait [#allocation6], 6144  }
  0x25   :  { %715 = vsyncadd [#allocation6], 4294961152  ;;  %v723_v0 = vmov 0   ;;  %v552_v1 = vld [vmem:[#allocation5 + $0x74] ss:$8 sps:$4 sm:$0xff]   ;;  %v81_v51 = vlaneseq  ;;  %s724_s10 = smov [#allocation8]  }
  0x26   :  { %203 = vmatprep.mubr.bf16.mxu0 %v723_v0  ;;  %v554_v2 = vld [vmem:[#allocation5 + $0x70] ss:$8 sps:$4 sm:$0xff]   ;;  %171 = vmatprep.subr.bf16.mxu0 %v552_v1  ;;  %v555_v3 = vld [vmem:[#allocation5 + $0x64] ss:$8 sps:$4 sm:$0xff]   ;;  %v557_v4 = vld [vmem:[#allocation5 + $0x60] ss:$8 sps:$4 sm:$0xff]  }
  0x27   :  { %172 = vmatpush1.bf16.msra.mxu0 %v554_v2  ;;  %v558_v5 = vld [vmem:[#allocation5 + $0x54] ss:$8 sps:$4 sm:$0xff]   ;;  %v560_v6 = vld [vmem:[#allocation5 + $0x50] ss:$8 sps:$4 sm:$0xff]   ;;  %v561_v7 = vld [vmem:[#allocation5 + $0x44] ss:$8 sps:$4 sm:$0xff]  }
  0x28   :  { %173 = vmatprep.subr.bf16.mxu0 %v555_v3  ;;  %v563_v8 = vld [vmem:[#allocation5 + $0x40] ss:$8 sps:$4 sm:$0xff]   ;;  %v564_v9 = vld [vmem:[#allocation5 + $0x34] ss:$8 sps:$4 sm:$0xff]   ;;  %v578_v11 = vld [vmem:[#allocation7 + $0x70] ss:$8 sps:$4 sm:$0xff]  }
  0x29   :  { %v576_v10 = vld [vmem:[#allocation7 + $0x74] ss:$8 sps:$4 sm:$0xff]   ;;  %v579_v12 = vld [vmem:[#allocation7 + $0x64] ss:$8 sps:$4 sm:$0xff]   ;;  %v566_v13 = vld [vmem:[#allocation5 + $0x30] ss:$8 sps:$4 sm:$0xff]  }
  0x2a   :  { %428 = vmatprep.subr.bf16.mxu1 %v576_v10  ;;  %v581_v14 = vld [vmem:[#allocation7 + $0x60] ss:$8 sps:$4 sm:$0xff]   ;;  %v582_v15 = vld [vmem:[#allocation7 + $0x54] ss:$8 sps:$4 sm:$0xff]   ;;  %v567_v16 = vld [vmem:[#allocation5 + $0x24] ss:$8 sps:$4 sm:$0xff]  }
  0x2b   :  { %174 = vmatpush1.bf16.msra.mxu0 %v557_v4  ;;  %429 = vmatpush1.bf16.msra.mxu1 %v578_v11  ;;  %v569_v17 = vld [vmem:[#allocation5 + $0x20] ss:$8 sps:$4 sm:$0xff]   ;;  %v584_v18 = vld [vmem:[#allocation7 + $0x50] ss:$8 sps:$4 sm:$0xff]   ;;  %v585_v19 = vld [vmem:[#allocation7 + $0x44] ss:$8 sps:$4 sm:$0xff]  }
  0x2c   :  { %175 = vmatprep.subr.bf16.mxu0 %v558_v5  ;;  %430 = vmatprep.subr.bf16.mxu1 %v579_v12  ;;  %v570_v20 = vld [vmem:[#allocation5 + $0x14] ss:$8 sps:$4 sm:$0xff]   ;;  %v572_v21 = vld [vmem:[#allocation5 + $0x10] ss:$8 sps:$4 sm:$0xff]   ;;  %v573_v22 = vld [vmem:[#allocation5 + $0x4] ss:$8 sps:$4 sm:$0xff]  }
  0x2d   :  { %v587_v23 = vld [vmem:[#allocation7 + $0x40] ss:$8 sps:$4 sm:$0xff]   ;;  %v588_v24 = vld [vmem:[#allocation7 + $0x34] ss:$8 sps:$4 sm:$0xff]   ;;  %v590_v25 = vld [vmem:[#allocation7 + $0x30] ss:$8 sps:$4 sm:$0xff]  }
  0x2e   :  { %v575_v26 = vld [vmem:[#allocation5] ss:$8 sps:$4 sm:$0xff]   ;;  %v61_v27 = vld [vmem:[#allocation2] sm:$0xff]  ;;  %v591_v28 = vld [vmem:[#allocation7 + $0x24] ss:$8 sps:$4 sm:$0xff]   ;;  %v82_v52 = vshrl.u32 %v81_v51, 7 }
  0x2f   :  { %176 = vmatpush1.bf16.msra.mxu0 %v560_v6  ;;  %431 = vmatpush1.bf16.msra.mxu1 %v581_v14  ;;  %v62_v29 = vpack.c.bf16 %v61_v27, %v61_v27  ;;  %v593_v30 = vld [vmem:[#allocation7 + $0x20] ss:$8 sps:$4 sm:$0xff]   ;;  %v594_v31 = vld [vmem:[#allocation7 + $0x14] ss:$8 sps:$4 sm:$0xff]   ;;  %v596_v32 = vld [vmem:[#allocation7 + $0x10] ss:$8 sps:$4 sm:$0xff]  }
  0x30   :  { %177 = vmatprep.subr.bf16.mxu0 %v561_v7  ;;  %432 = vmatprep.subr.bf16.mxu1 %v582_v15  ;;  %v597_v33 = vld [vmem:[#allocation7 + $0x4] ss:$8 sps:$4 sm:$0xff]   ;;  %v599_v34 = vld [vmem:[#allocation7] ss:$8 sps:$4 sm:$0xff]   ;;  %v600_v35 = vld [vmem:[#allocation7 + $0xf4] ss:$8 sps:$4 sm:$0xff]  }
  0x31   :  { %v602_v36 = vld [vmem:[#allocation7 + $0xf0] ss:$8 sps:$4 sm:$0xff]   ;;  %v603_v37 = vld [vmem:[#allocation7 + $0xe4] ss:$8 sps:$4 sm:$0xff]   ;;  %v605_v38 = vld [vmem:[#allocation7 + $0xe0] ss:$8 sps:$4 sm:$0xff]  }
  0x32   :  { %v606_v39 = vld [vmem:[#allocation7 + $0xd4] ss:$8 sps:$4 sm:$0xff]   ;;  %v608_v40 = vld [vmem:[#allocation7 + $0xd0] ss:$8 sps:$4 sm:$0xff]   ;;  %v609_v41 = vld [vmem:[#allocation7 + $0xc4] ss:$8 sps:$4 sm:$0xff]  }
  0x33   :  { %178 = vmatpush1.bf16.msra.mxu0 %v563_v8  ;;  %433 = vmatpush1.bf16.msra.mxu1 %v584_v18  ;;  %v611_v42 = vld [vmem:[#allocation7 + $0xc0] ss:$8 sps:$4 sm:$0xff]   ;;  %v612_v43 = vld [vmem:[#allocation7 + $0xb4] ss:$8 sps:$4 sm:$0xff]   ;;  %v614_v44 = vld [vmem:[#allocation7 + $0xb0] ss:$8 sps:$4 sm:$0xff]  }
  0x34   :  { %179 = vmatprep.subr.bf16.mxu0 %v564_v9  ;;  %434 = vmatprep.subr.bf16.mxu1 %v585_v19  ;;  %v615_v45 = vld [vmem:[#allocation7 + $0xa4] ss:$8 sps:$4 sm:$0xff]   ;;  %v617_v46 = vld [vmem:[#allocation7 + $0xa0] ss:$8 sps:$4 sm:$0xff]   ;;  %v618_v47 = vld [vmem:[#allocation7 + $0x94] ss:$8 sps:$4 sm:$0xff]  }
  0x35   :  { %v620_v48 = vld [vmem:[#allocation7 + $0x90] ss:$8 sps:$4 sm:$0xff]   ;;  %v621_v49 = vld [vmem:[#allocation7 + $0x84] ss:$8 sps:$4 sm:$0xff]   ;;  %v623_v50 = vld [vmem:[#allocation7 + $0x80] ss:$8 sps:$4 sm:$0xff]  }
  0x36   :  { %v83_v53 = vsub.s32 0, %v82_v52  ;;  %v79_v54 = vld [vmem:[%s775_s2] sm:$0x3]  ;;  %v87_v55 = vsub.s32 1, %v82_v52  ;;  %s487_s11 = sshll.u32 %s724_s10, 4  ;;  %s488_s11 = int_to_ptr.vmem [resolvable:$true] %s487_s11 }
  0x37   :  { %180 = vmatpush1.bf16.msra.mxu0 %v566_v13  ;;  %435 = vmatpush1.bf16.msra.mxu1 %v587_v23  ;;  %v256_v12 = vld [vmem:[%s777_s4] sm:$0x3]  ;;  %s692_s4 = scalar_lea.vmem %s488_s11, 256  ;;  %p697_p2 = scmp.lt.s32.totalorder %s488_s11, %s488_s11 }
  0x38   :  { %181 = vmatprep.subr.bf16.mxu0 %v567_v16  ;;  %436 = vmatprep.subr.bf16.mxu1 %v588_v24  ;;  %v84_v56 = vrot.slane %v79_v54, %v83_v53  ;;  %v88_v57 = vrot.slane %v79_v54, %v87_v55  ;;  %v261_v13 = vrot.slane %v256_v12, %v83_v53  ;;  %p693_p1 = scmp.ne.s32.totalorder %s488_s11, %s692_s4  ;;  %p698_p3 = scmp.lt.s32.totalorder %s692_s4, %s692_s4 }
  0x39   :  { %v265_v14 = vrot.slane %v256_v12, %v87_v55 }
  0x3a   :  { %p699_p4 = por %p698_p3, %p697_p2 }
  0x3b   :  { %182 = vmatpush1.bf16.msra.mxu0 %v569_v17  ;;  %437 = vmatpush1.bf16.msra.mxu1 %v590_v25 }
  0x3c   :  { %183 = vmatprep.subr.bf16.mxu0 %v570_v20  ;;  %438 = vmatprep.subr.bf16.mxu1 %v591_v28  ;;  %p700_p5 = pnand %p699_p4, %p693_p1 }
  0x3f   :  { %184 = vmatpush1.bf16.msra.mxu0 %v572_v21  ;;  %439 = vmatpush1.bf16.msra.mxu1 %v593_v30 }
  0x40   :  { %185 = vmatprep.subr.bf16.mxu0 %v573_v22  ;;  %440 = vmatprep.subr.bf16.mxu1 %v594_v31 }
  0x43   :  { %186 = vmatpush1.bf16.msra.mxu0 %v575_v26  ;;  %441 = vmatpush1.bf16.msra.mxu1 %v596_v32 }
  0x44   :  { %442 = vmatprep.subr.bf16.mxu1 %v597_v33 }
  0x46   :  { %204 = vmatmul.mubr.bf16.vlgmr.msra.gmra.mxu0 %v62_v29 }
  0x47   :  { %443 = vmatpush1.bf16.msra.mxu1 %v599_v34 }
  0x48   :  { %444 = vmatprep.subr.bf16.mxu1 %v600_v35 }
  0x4b   :  { %445 = vmatpush2.bf16.msra.mxu1 %v602_v36 }
  0x4c   :  { %446 = vmatprep.subr.bf16.mxu1 %v603_v37 }
  0x4f   :  { %447 = vmatpush2.bf16.msra.mxu1 %v605_v38 }
  0x50   :  { %448 = vmatprep.subr.bf16.mxu1 %v606_v39 }
  0x53   :  { %449 = vmatpush2.bf16.msra.mxu1 %v608_v40 }
  0x54   :  { %450 = vmatprep.subr.bf16.mxu1 %v609_v41 }
  0x57   :  { %451 = vmatpush2.bf16.msra.mxu1 %v611_v42 }
  0x58   :  { %452 = vmatprep.subr.bf16.mxu1 %v612_v43 }
  0x5b   :  { %453 = vmatpush2.bf16.msra.mxu1 %v614_v44 }
  0x5c   :  { %454 = vmatprep.subr.bf16.mxu1 %v615_v45 }
  0x5f   :  { %455 = vmatpush2.bf16.msra.mxu1 %v617_v46 }
  0x60   :  { %456 = vmatprep.subr.bf16.mxu1 %v618_v47 }
  0x63   :  { %457 = vmatpush2.bf16.msra.mxu1 %v620_v48 }
  0x64   :  { %458 = vmatprep.subr.bf16.mxu1 %v621_v49 }
  0x67   :  { %459 = vmatpush2.bf16.msra.mxu1 %v623_v50 }
 0x106   :  { %v205_v58 = vpop.f32.mrf.mxu0 }
 0x107   :  { %v206_v59 = vadd.f32 %v205_v58, %v84_v56 }
 0x108   :  { %v207_v60 = vpop.f32.mrf.mxu0 }
 0x109   :  { %v214_v61 = vmul.f32 0.70710677, %v206_v59  ;;  %v208_v62 = vadd.f32 %v207_v60, %v88_v57  ;;  %v212_v5 = vmul.f32 0.5, %v206_v59 }
 0x10a   :  { %v209_v63 = vpop.f32.mrf.mxu0 }
 0x10b   :  { %624 = verf.f32 %v214_v61  ;;  %v215_v0 = vmul.f32 0.70710677, %v208_v62  ;;  %v213_v6 = vmul.f32 0.5, %v208_v62 }
 0x10c   :  { %v210_v1 = vpop.f32.mrf.mxu0 }
 0x10d   :  { %626 = verf.f32 %v215_v0 }
 0x118   :  { %v625_v2 = vpop.eup %624 }
 0x119   :  { %v218_v3 = vadd.f32 1.0, %v625_v2 }
 0x11a   :  { %v627_v4 = vpop.eup %626 }
 0x11b   :  { %v219_v7 = vadd.f32 1.0, %v627_v4  ;;  %v220_v8 = vmul.f32 %v218_v3, %v212_v5 }
 0x11d   :  { %v221_v9 = vmul.f32 %v219_v7, %v213_v6  ;;  %v254_v11 = vpack.c.bf16 %v220_v8, %v220_v8 }
 0x11f   :  { %v255_v10 = vpack.c.bf16 %v221_v9, %v221_v9 }
 0x121   :  { %460 = vmatprep.mubr.bf16.mxu1 %v255_v10 }
 0x122   :  { %461 = vmatmul.mubr.bf16.vlgmr.msra.gmra.mxu1 %v254_v11 }
 0x1e2   :  { %v462_v15 = vpop.f32.mrf.mxu1 }
 0x1e3   :  { %v463_v16 = vadd.f32 %v462_v15, %v261_v13 }
 0x1e4   :  { %v464_v17 = vpop.f32.mrf.mxu1 }
 0x1e5   :  { %v471_v18 = vmul.f32 0.70710677, %v463_v16  ;;  %v465_v19 = vadd.f32 %v464_v17, %v265_v14  ;;  %v469_v24 = vmul.f32 0.5, %v463_v16 }
 0x1e6   :  { %v466_v20 = vpop.f32.mrf.mxu1 }
 0x1e7   :  { %628 = verf.f32 %v471_v18  ;;  %v472_v21 = vmul.f32 0.70710677, %v465_v19  ;;  %v470_v28 = vmul.f32 0.5, %v465_v19 }
 0x1e8   :  { %v467_v22 = vpop.f32.mrf.mxu1 }
 0x1e9   :  { %630 = verf.f32 %v472_v21 }
 0x1f4   :  { %v629_v23 = vpop.eup %628 }
 0x1f5   :  { %v475_v25 = vadd.f32 1.0, %v629_v23 }
 0x1f6   :  { %v631_v26 = vpop.eup %630 }
 0x1f7   :  { %v477_v27 = vmul.f32 %v475_v25, %v469_v24  ;;  %v476_v29 = vadd.f32 1.0, %v631_v26 }
 0x1f9   :  { %479 = vst [vmem:[#allocation8] sm:$0xff] %v477_v27  ;;  %v478_v30 = vmul.f32 %v476_v29, %v470_v28 }
 0x1fb   :  { %480 = vst [vmem:[#allocation8 + $0x8] sm:$0xff] %v478_v30 }
 0x1fc   :  { %703 = shalt.err (!%p700_p5)
}
 0x1fd   :  { %490 = dma.vmem_to_hbm [thread:$0]  %s488_s11, 256, %s778_s5, [#allocation4]  }
 0x1fe   :  { %716 = dma.done.wait [#allocation4], 256  }
 0x1ff   :  { %717 = vsyncadd [#allocation4], 4294967040 }
 0x200   :  { %494 = vsyncpa [#allocation3], 1 }
 0x201   :  { %495 = vsyncpa [#allocation6], 1 }
 0x202   :  { %496 = vsyncpa [#allocation4], 1 }

</bundles_post_ra>
